<compile_context>
chip_gen: v5e
topology: v5e:2x2
jax: 0.10.0
libtpu: 0.0.40
codegen_flags: <defaults>
</compile_context>

<pallas_src>
import functools

import jax
import jax.numpy as jnp
import numpy as np
from jax.experimental import pallas as pl
from jax.experimental.pallas import tpu as pltpu


def _dropout_kernel(x_ref, bits_ref, o_ref, *, threshold, inv_keep_p):
    # keep element iff its random 32-bit word falls below round(p * 2^32).
    keep = bits_ref[...] < jnp.uint32(threshold)
    scaled = x_ref[...] * jnp.asarray(inv_keep_p, dtype=x_ref.dtype)
    o_ref[...] = jnp.where(keep, scaled, jnp.zeros_like(scaled))


def _pick_block_rows(batch, d_in, itemsize, max_rows=512,
                     target_tile_bytes=2 << 20):
    """Rows per tile: full batch if small, else <=512 rows, multiple of 8,
    capped so one (rows, d_in) tile stays ~2 MiB (safe for v7x VMEM)."""
    if batch <= max_rows:
        return batch                      # full-dim block is always legal
    rows = min(max_rows, max(8, target_tile_bytes // max(1, d_in * itemsize)))
    rows = max(8, (rows // 8) * 8)
    return rows


def dropout_mm_forward(x, key, p=0.9, training=True):
    """DropoutMM.forward: MC dropout with keep probability p.

    Args:
      x: (batch_size, d_in) float array.
      key: jax PRNG key used to draw the dropout mask.
      p: keep probability (module wraps torch.nn.Dropout(1 - p)).
      training: if False, dropout is identity (PyTorch eval mode).
    """
    if not training or p >= 1.0:
        return x
    assert x.ndim == 2, "expect (batch_size, d_in)"
    batch, d_in = x.shape

    # One uint32 random word per element, generated outside the kernel.
    bits = jax.random.bits(key, shape=x.shape, dtype=jnp.uint32)

    threshold = min(int(round(float(p) * (1 << 32))), (1 << 32) - 1)
    bm = _pick_block_rows(batch, d_in, jnp.dtype(x.dtype).itemsize)
    grid = (pl.cdiv(batch, bm),)

    kernel = functools.partial(
        _dropout_kernel, threshold=threshold, inv_keep_p=1.0 / float(p))

    x_spec = pl.BlockSpec((bm, d_in), lambda i: (i, 0))
    bits_spec = pl.BlockSpec((bm, d_in), lambda i: (i, 0))
    out_spec = pl.BlockSpec((bm, d_in), lambda i: (i, 0))

    return pl.pallas_call(
        kernel,
        out_shape=jax.ShapeDtypeStruct(x.shape, x.dtype),
        grid=grid,
        in_specs=[x_spec, bits_spec],
        out_specs=out_spec,
        compiler_params=pltpu.CompilerParams(
            dimension_semantics=("parallel",)),
    )(x, bits)


if __name__ == "__main__":
    root = jax.random.PRNGKey(0)
    key_x, key_mask = jax.random.split(root)

    batch_size, d_in = 8, 128          # shapes implied by forward: (batch, d_in)
    p = 0.9                            # default keep probability of DropoutMM

    x = jax.random.normal(key_x, (batch_size, d_in), dtype=jnp.float32)

    y = dropout_mm_forward(x, key_mask, p=p, training=True)
    y = jax.block_until_ready(y)

    # Sanity checks: every nonzero output element equals x / p, and the kept
    # fraction is in a plausible range around p.
    y_np = np.asarray(y)
    x_np = np.asarray(x)
    kept = y_np != 0.0
    np.testing.assert_allclose(y_np[kept], (x_np / p)[kept], rtol=1e-6, atol=1e-6)
    keep_frac = kept.mean()
    assert 0.8 < keep_frac <= 1.0, f"unexpected keep fraction {keep_frac}"

    # Eval mode is the identity.
    y_eval = dropout_mm_forward(x, key_mask, p=p, training=False)
    np.testing.assert_allclose(np.asarray(y_eval), x_np)

    print("KERNEL_OK")
</pallas_src>

<mosaic_0001>
module attributes {stable_mosaic.version = 11 : i64} {
  func.func @_dropout_kernel(%arg0: i32, %arg1: memref<8x128xf32, #tpu.memory_space<vmem>>, %arg2: memref<8x128xi32, #tpu.memory_space<vmem>>, %arg3: memref<8x128xf32, #tpu.memory_space<vmem>>) attributes {dimension_semantics = [#tpu.dimension_semantics<parallel>], iteration_bounds = array<i64: 1>, scalar_prefetch = 0 : i64, scratch_operands = 0 : i64, tpu.core_type = #tpu.core_type<tc>, window_params = [{transform_indices = @transform_0, window_bounds = array<i64: 8, 128>}, {transform_indices = @transform_1, window_bounds = array<i64: 8, 128>}, {transform_indices = @transform_2, window_bounds = array<i64: 8, 128>}]} {
    %c0 = arith.constant 0 : index
    %c0_0 = arith.constant 0 : index
    %0 = vector.load %arg2[%c0, %c0_0] : memref<8x128xi32, #tpu.memory_space<vmem>>, vector<8x128xi32>
    %c-429496730_i32 = arith.constant -429496730 : i32
    %1 = vector.broadcast %c-429496730_i32 : i32 to vector<8x128xi32>
    %2 = arith.cmpi ult, %0, %1 : vector<8x128xi32>
    %c0_1 = arith.constant 0 : index
    %c0_2 = arith.constant 0 : index
    %3 = vector.load %arg1[%c0_1, %c0_2] : memref<8x128xf32, #tpu.memory_space<vmem>>, vector<8x128xf32>
    %cst = arith.constant 1.11111116 : f32
    %4 = vector.broadcast %cst : f32 to vector<8x128xf32>
    %5 = arith.mulf %3, %4 : vector<8x128xf32>
    %cst_3 = arith.constant 0.000000e+00 : f32
    %6 = vector.broadcast %cst_3 : f32 to vector<8x128xf32>
    %7 = arith.select %2, %5, %6 : vector<8x128xi1>, vector<8x128xf32>
    %c0_4 = arith.constant 0 : index
    %c0_5 = arith.constant 0 : index
    %8 = vector.load %arg3[%c0_4, %c0_5] : memref<8x128xf32, #tpu.memory_space<vmem>>, vector<8x128xf32>
    tpu.vector_store %arg3[%c0_4, %c0_5], %7 {strides = array<i32>} : memref<8x128xf32, #tpu.memory_space<vmem>>, vector<8x128xf32>,
    return
  }
  func.func @transform_0(%arg0: i32) -> (i32, i32) {
    %c0_i32 = arith.constant 0 : i32
    %c0_i32_0 = arith.constant 0 : i32
    return %arg0, %c0_i32 : i32, i32
  }
  func.func @transform_1(%arg0: i32) -> (i32, i32) {
    %c0_i32 = arith.constant 0 : i32
    %c0_i32_0 = arith.constant 0 : i32
    return %arg0, %c0_i32 : i32, i32
  }
  func.func @transform_2(%arg0: i32) -> (i32, i32) {
    %c0_i32 = arith.constant 0 : i32
    %c0_i32_0 = arith.constant 0 : i32
    return %arg0, %c0_i32 : i32, i32
  }
}

</mosaic_0001>

<bundles_post_ra>
// kernel: tpu_custom_call.1
= control target key start
LH: loop header
LB: loop body
LE: loop exit
PB: predicated region body
PF: predicated region fallthrough
CT: control target
= control target key end

     0   :  { %7 = vsyncpa [#allocation3], 0  ;;  %s175_s0 = inlined_call_operand.hbm [shape: f32[8,128], index: 0, kind: input, shape index: {}]   ;;  %s176_s1 = inlined_call_operand.hbm [shape: u32[8,128], index: 1, kind: input, shape index: {}]   ;;  %s177_s2 = inlined_call_operand.hbm [shape: f32[8,128], index: 2, kind: output, shape index: {}]  }
   0x1   :  { %8 = vsyncpa [#allocation6], 0 }
   0x2   :  { %9 = vsyncpa [#allocation4], 0  ;;  %s15_s11 = sshll.u32 %s175_s0, 4  ;;  %s148_s12 = smov [#allocation2]   ;;  %s16_s11 = int_to_ptr.hbm [resolvable:$true] %s15_s11 }
   0x3   :  { %s17_s13 = sshll.u32 %s148_s12, 4  ;;  %s26_s16 = sshll.u32 %s176_s1, 4  ;;  %s18_s13 = int_to_ptr.vmem [resolvable:$true] %s17_s13  ;;  %s27_s16 = int_to_ptr.hbm [resolvable:$true] %s26_s16 }
   0x4   :  { %20 = dma.hbm_to_vmem [thread:$0]  %s16_s11, 128, %s18_s13, [#allocation3]  }
   0x5   :  { %s149_s17 = smov [#allocation5]  }
   0x6   :  { %s28_s18 = sshll.u32 %s149_s17, 4  ;;  %s29_s18 = int_to_ptr.vmem [resolvable:$true] %s28_s18 }
   0x7   :  { %31 = dma.hbm_to_vmem [thread:$0]  %s27_s16, 128, %s29_s18, [#allocation6]  }
   0x8   :  { %142 = dma.done.wait [#allocation3], 128  }
   0x9   :  { %143 = vsyncadd [#allocation3], 4294967168 }
   0xa   :  { %144 = dma.done.wait [#allocation6], 128  }
   0xb   :  { %145 = vsyncadd [#allocation6], 4294967168  ;;  %v40_v0 = vld [vmem:[#allocation5] sm:$0xff]  ;;  %v44_v1 = vld [vmem:[#allocation2] sm:$0xff]  ;;  %s150_s0 = smov [#allocation7]   ;;  %s55_s22 = sshll.u32 %s177_s2, 4  ;;  %s56_s22 = int_to_ptr.hbm [resolvable:$true] %s55_s22 }
   0xc   :  { %s53_s19 = sshll.u32 %s150_s0, 4  ;;  %v66_v2 = vxor.u32 2147483648, %v40_v0  ;;  %v45_v3 = vmul.f32 1.1111112, %v44_v1  ;;  %s54_s19 = int_to_ptr.vmem [resolvable:$true] %s53_s19 }
   0xe   :  { %vm43_vm0 = vcmp.lt.s32.totalorder %v66_v2, 1717986918 }
   0xf   :  { %v46_v4 = vsel %vm43_vm0, %v45_v3, 0.0 }
  0x10   :  { %47 = vst [vmem:[#allocation7] sm:$0xff] %v46_v4 }
  0x11   :  { %58 = dma.vmem_to_hbm [thread:$0]  %s54_s19, 128, %s56_s22, [#allocation4]  }
  0x12   :  { %146 = dma.done.wait [#allocation4], 128  }
  0x13   :  { %147 = vsyncadd [#allocation4], 4294967168 }
  0x14   :  { %63 = vsyncpa [#allocation3], 1 }
  0x15   :  { %64 = vsyncpa [#allocation6], 1 }
  0x16   :  { %65 = vsyncpa [#allocation4], 1 }

</bundles_post_ra>
